<compile_context>
chip_gen: v6e
topology: v6e:2x2x1
jax: 0.10.0
libtpu: 0.0.40
codegen_flags: <defaults>
</compile_context>

<pallas_src>
import jax
import jax.numpy as jnp
from jax.experimental import pallas as pl
from jax.experimental.pallas import tpu as pltpu


_PER_TILE_BYTES = 4 * 1024 * 1024      # per-buffer budget -> 4-8 MiB HBM traffic / step
_VMEM_LIMIT_BYTES = 32 * 1024 * 1024   # explicit scoped-VMEM limit (safe on v5e/v6e/v7x)


def _sublane_multiple(dtype):
    """Packed sublane count: 8 for 4-byte, 16 for 2-byte, 32 for 1-byte dtypes."""
    return max(8, 32 // jnp.dtype(dtype).itemsize)


def _pick_channel_tile(C, lanes, itemsize, sub, budget=_PER_TILE_BYTES):
    """Largest TC that is a multiple of `sub`, divides C and fits the tile budget."""
    if C % sub != 0:
        return C  # block must equal the full (unaligned) dim, e.g. C=4
    tc = sub
    cand = sub
    while cand <= C:
        if C % cand == 0 and cand * lanes * itemsize <= budget:
            tc = cand
        cand += sub
    return tc


def _copy_kernel(x_ref, o_ref):
    # x_ref / o_ref: (TC, T_HW) — straight VMEM copy; transpose is in the specs.
    o_ref[...] = x_ref[...]


def _grouped_kernel(x_ref, o_ref):
    # x_ref: (G, TC, HW)  ->  o_ref: (TC, G*HW) lane-dense output slab.
    # G is small and static; unrolled Python loop keeps the lowering simple
    # (per-image offset stores inside VMEM; the HBM writeback stays lane-dense).
    g, _, hw = x_ref.shape
    for i in range(g):
        o_ref[:, i * hw:(i + 1) * hw] = x_ref[i]


def batchnorm2d_input(x):
    """x: (N, C, H, W) -> (x.permute(1,0,2,3).reshape(C, N*H*W), N, C, H, W)."""
    N, C, H, W = x.shape
    HW = H * W
    x3 = x.reshape(N, C, HW)  # contiguous view, lane-dense last axis
    itemsize = jnp.dtype(x.dtype).itemsize
    sub = _sublane_multiple(x.dtype)

    out_shape = jax.ShapeDtypeStruct((C, N * HW), x.dtype)
    cost = pl.CostEstimate(
        flops=0, transcendentals=0, bytes_accessed=2 * N * C * HW * itemsize
    )

    def _params(ndim):
        return pltpu.CompilerParams(
            dimension_semantics=("parallel",) * ndim,
            vmem_limit_bytes=_VMEM_LIMIT_BYTES,
        )

    if HW % 128 == 0:
        # --- lane-aligned spatial extent: plain tiled copy -------------------
        tc_min = sub if C % sub == 0 else C
        if tc_min * HW * itemsize <= _PER_TILE_BYTES:
            t_hw = HW  # whole-row tiles -> fully contiguous input DMA
        else:
            # Tile HW only when the budget forces it; largest 128-multiple divisor.
            max_lanes = max(128, (_PER_TILE_BYTES // (tc_min * itemsize)) // 128 * 128)
            t_hw = 128
            t = 128
            while t <= min(HW, max_lanes):
                if HW % t == 0:
                    t_hw = t
                t += 128
        TC = _pick_channel_tile(C, t_hw, itemsize, sub)

        if t_hw == HW:
            # grid = (C//TC, N): no spatial axis; N (output-column axis) innermost.
            grid = (C // TC, N)
            in_spec = pl.BlockSpec((None, TC, HW), lambda c, n: (n, c, 0))
            out_spec = pl.BlockSpec((TC, HW), lambda c, n: (c, n))
        else:
            n_hw = HW // t_hw
            grid = (C // TC, N, n_hw)  # h innermost: adjacent output column slabs
            in_spec = pl.BlockSpec((None, TC, t_hw), lambda c, n, h: (n, c, h))
            out_spec = pl.BlockSpec((TC, t_hw), lambda c, n, h: (c, n * n_hw + h))

        out = pl.pallas_call(
            _copy_kernel,
            out_shape=out_shape,
            grid=grid,
            in_specs=[in_spec],
            out_specs=out_spec,
            compiler_params=_params(len(grid)),
            cost_estimate=cost,
        )(x3)
    else:
        # --- HW not a multiple of 128 (small feature maps): group images -----
        # Smallest group G with (G*HW) % 128 == 0 so the output slab is
        # lane-dense; fall back to G = N (block equals full output width).
        g = N
        for cand in range(1, N + 1):
            if N % cand == 0 and (cand * HW) % 128 == 0:
                g = cand
                break
        TC = _pick_channel_tile(C, g * HW, itemsize, sub)
        grid = (C // TC, N // g)
        in_spec = pl.BlockSpec((g, TC, HW), lambda c, n: (n, c, 0))
        out_spec = pl.BlockSpec((TC, g * HW), lambda c, n: (c, n))

        out = pl.pallas_call(
            _grouped_kernel,
            out_shape=out_shape,
            grid=grid,
            in_specs=[in_spec],
            out_specs=out_spec,
            compiler_params=_params(2),
            cost_estimate=cost,
        )(x3)

    return out, N, C, H, W


def _reference(x):
    N, C, H, W = x.shape
    return jnp.transpose(x, (1, 0, 2, 3)).reshape(C, N * H * W)


if __name__ == "__main__":
    key = jax.random.PRNGKey(0)
    k0, k1, k2, k3 = jax.random.split(key, 4)

    # Primary shape implied by the module: small NCHW feature map.
    N, C, H, W = 2, 4, 16, 16
    x = jax.random.normal(k0, (N, C, H, W), dtype=jnp.float32)
    out, n_, c_, h_, w_ = batchnorm2d_input(x)
    out = jax.block_until_ready(out)
    assert out.shape == (C, N * H * W)
    assert out.dtype == x.dtype
    assert (n_, c_, h_, w_) == (N, C, H, W)
    assert jnp.allclose(out, _reference(x))

    # 8-aligned channel tile, whole-row (contiguous) input DMA path.
    x2 = jax.random.normal(k1, (2, 16, 16, 16), dtype=jnp.float32)
    out2, *_ = batchnorm2d_input(x2)
    out2 = jax.block_until_ready(out2)
    assert jnp.allclose(out2, _reference(x2))

    # HW < 128 (ResNet-20-style 8x8 map): grouped lane-dense output path.
    x3 = jax.random.normal(k2, (2, 16, 8, 8), dtype=jnp.float32)
    out3, *_ = batchnorm2d_input(x3)
    out3 = jax.block_until_ready(out3)
    assert jnp.allclose(out3, _reference(x3))

    # bf16: dtype-aware sublane multiple (16) for the channel tile.
    x4 = jax.random.normal(k3, (2, 32, 16, 16)).astype(jnp.bfloat16)
    out4, *_ = batchnorm2d_input(x4)
    out4 = jax.block_until_ready(out4)
    assert jnp.array_equal(out4, _reference(x4))

    print("KERNEL_OK")
</pallas_src>

<mosaic_0001>
module attributes {stable_mosaic.version = 11 : i64} {
  func.func @_copy_kernel(%arg0: i32, %arg1: i32, %arg2: memref<1x4x256xf32, #tpu.memory_space<vmem>>, %arg3: memref<4x256xf32, #tpu.memory_space<vmem>>) attributes {dimension_semantics = [#tpu.dimension_semantics<parallel>, #tpu.dimension_semantics<parallel>], iteration_bounds = array<i64: 1, 2>, scalar_prefetch = 0 : i64, scratch_operands = 0 : i64, tpu.core_type = #tpu.core_type<tc>, window_params = [{transform_indices = @transform_0, window_bounds = array<i64: 1, 4, 256>}, {transform_indices = @transform_1, window_bounds = array<i64: 4, 256>}]} {
    %c0 = arith.constant 0 : index
    %c0_0 = arith.constant 0 : index
    %c0_1 = arith.constant 0 : index
    %0 = vector.load %arg2[%c0, %c0_0, %c0_1] : memref<1x4x256xf32, #tpu.memory_space<vmem>>, vector<1x4x256xf32>
    %1 = vector.shape_cast %0 : vector<1x4x256xf32> to vector<4x256xf32>
    %c0_2 = arith.constant 0 : index
    %c0_3 = arith.constant 0 : index
    %2 = vector.load %arg3[%c0_2, %c0_3] : memref<4x256xf32, #tpu.memory_space<vmem>>, vector<4x256xf32>
    tpu.vector_store %arg3[%c0_2, %c0_3], %1 {strides = array<i32>} : memref<4x256xf32, #tpu.memory_space<vmem>>, vector<4x256xf32>,
    return
  }
  func.func @transform_0(%arg0: i32, %arg1: i32) -> (i32, i32, i32) {
    %c0_i32 = arith.constant 0 : i32
    %c0_i32_0 = arith.constant 0 : i32
    return %arg1, %arg0, %c0_i32 : i32, i32, i32
  }
  func.func @transform_1(%arg0: i32, %arg1: i32) -> (i32, i32) {
    %c0_i32 = arith.constant 0 : i32
    return %arg0, %arg1 : i32, i32
  }
}

</mosaic_0001>

<bundles_post_ra>
// kernel: tpu_custom_call.1
= control target key start
LH: loop header
LB: loop body
LE: loop exit
PB: predicated region body
PF: predicated region fallthrough
CT: control target
= control target key end

     0   :  { %6 = vsyncpa [#allocation3], 0  ;;  %s596_s0 = inlined_call_operand.hbm [shape: f32[2,4,256], index: 0, kind: input, shape index: {}]   ;;  %s597_s1 = inlined_call_operand.hbm [shape: f32[4,512], index: 1, kind: output, shape index: {}]  }
   0x1   :  { %8 = vsyncpa [#allocation3 + $0x1], 0 }
   0x2   :  { %9 = vsyncpa [#allocation4], 0 }
   0x3   :  { %11 = vsyncpa [#allocation4 + $0x1], 0  ;;  %s456_s6 = smov 0   ;;  %s458_s7 = smov 0  }
   0x4   :  { %s460_s8 = smov 0   ;;  %s462_s9 = smov 0  }
   0x5   :  { %s464_s10 = smov 0   ;;  %s466_s11 = smov 0  }
   0x6 LB: > { %s255_s12 = sadd.s32 4294967295, %s442_s11   ;;  %s256_s13 = sadd.s32 4294967294, %s442_s11   ;;  %s442_s11 = sphi %s466_s11, %s17_s11   ;;  %s438_s10 = sphi %s464_s10, %s609_s10   ;;  %s434_s9 = sphi %s462_s9, %s608_s9   ;;  %s430_s8 = sphi %s460_s8, %s607_s8   ;;  %s426_s7 = sphi %s458_s7, %s606_s7   ;;  %s422_s6 = sphi %s456_s6, %s605_s6  }
   0x7   : > { %s26_s14 = sadd.s32 1, %s438_s10  ;;  %s38_s15 = sadd.s32 1, %s430_s8 }
   0x8   : > { %p27_p0 = scmp.ge.s32.totalorder %s26_s14, 2  ;;  %p45_p1 = scmp.ne.s32.totalorder %s430_s8, %s426_s7 }
   0x9   : > { %p46_p2 = scmp.eq.s32.totalorder %s442_s11, 0  ;;  %p51_p3 = scmp.ne.s32.totalorder %s426_s7, %s422_s6 }
   0xa   : > { %s611_s14 = smov (%p27_p0, %s26_s14), 0  ;;  %p52_p5 = scmp.eq.s32.totalorder %s255_s12, 0 }
   0xb   : > { %p497_p4 = por %p46_p2, %p45_p1  ;;  %s33_s17 = ssub.s32 %s438_s10, %s611_s14 }
   0xc   : > { %p77_p6 = scmp.eq.s32.totalorder %s255_s12, 1  ;;  %p36_p7 = scmp.eq.s32.totalorder %s33_s17, 0 }
   0xd   : > { %p503_p8 = por %p52_p5, %p51_p3  ;;  %p83_p10 = scmp.eq.s32.totalorder %s256_s13, 1 }
   0xe   : > { %p507_p9 = por %p77_p6, %p45_p1  ;;  %p284_p13 = scmp.lt.s32.totalorder %s442_s11, 2 }
   0xf   : > { %s512_s20 = scalar_select %p36_p7, %s430_s8, %s38_s15  }
  0x10   : > { %p514_p11 = por %p83_p10, %p51_p3  ;;  %s103_s22 = sand.u32 1, %s430_s8  }
  0x11   : > { %s259_s23 = sshll.u32 %s103_s22, 3  ;;  %s270_s24 = sshll.u32 %s438_s10, 7 }
  0x12   : > { %s601_s21 = scalar_select %p514_p11, 1, 0 }
  0x13   : > { %s115_s27 = scalar_lea.hbm %s596_s0, %s270_s24  ;;  %s107_s28 = scalar_lea.vmem [#allocation2], %s259_s23 }
  0x14   : > { %s117_s29 = sshll.u32 %s107_s28, 4  ;;  %p527_p0 = pnand %p284_p13, %p497_p4  ;;  %s118_s29 = int_to_ptr.vmem [resolvable:$true] %s117_s29 }
  0x15   : > { %p262_p1 = scmp.ge.s32.totalorder %s442_s11, 1  ;;  %p122_p2 = scmp.lt.s32.totalorder %s442_s11, 3 }
  0x16   : > { %s104_s2 = scalar_lea.sflag [#allocation3], %s103_s22  ;;  %p336_p3 = pneg %p527_p0 }
  0x17   : > { %s347_s3 = scalar_lea.vmem %s118_s29, 128  ;;  %s444_s4 = smov [#allocation2]  }
  0x18   : > { %p348_p5 = scmp.ne.s32.totalorder %s118_s29, %s347_s3  ;;  %s352_s5 = sshll.u32 %s444_s4, 4  ;;  %s353_s5 = int_to_ptr.vmem [resolvable:$false] %s352_s5 }
  0x19   : > { %s354_s12 = scalar_lea.vmem %s353_s5, 256  ;;  %p355_p10 = scmp.lt.s32.totalorder %s118_s29, %s353_s5 }
  0x1a   : > { %p350_p6 = pnand %p348_p5, %p336_p3  ;;  %p356_p12 = scmp.lt.s32.totalorder %s354_s12, %s347_s3 }
  0x1c   : > { %p351_p7 = pneg %p350_p6  ;;  %p357_p4 = por %p356_p12, %p355_p10 }
  0x1e   : > { %p358_p13 = pnand %p357_p4, %p351_p7 }
  0x20   : > { %361 = shalt.err (!%p358_p13)
}
  0x21   : > { %279 = dma.hbm_to_vmem [thread:$0]  (!%p527_p0), %s115_s27, 128, %s118_s29, %s104_s2  }
  0x22   : > { %p123_p11 = pnand %p262_p1, %p122_p2 }
  0x23   : > { %s542_s13 = sand.u32 (!%p123_p11), 1, %s426_s7  }
  0x24   : > { %126 = sbr.rel (%p123_p11) target bundleno = 66 (0x42), region = 24  ;;  %s263_s15 = sshll.u32 (!%p123_p11), %s542_s13, 3 }
  0x25   : > { %s129_s16 = scalar_lea.sflag (!%p123_p11), [#allocation3], %s542_s13  ;;  %s132_s17 = scalar_lea.vmem (!%p123_p11), [#allocation2], %s263_s15 }
  0x29   : > { %413 = dma.done.wait (%p503_p8), %s129_s16, 128  }
  0x2a   : > { %415 = vsyncadd (%p503_p8), %s129_s16, 4294967168  ;;  %s150_s22 = scalar_lea.vmem [#allocation5], %s263_s15  ;;  %s271_s24 = sshll.u32 %s434_s9, 7  ;;  %v152_v0 = vld [vmem:[%s132_s17] sm:$0xff] }
  0x2b   : > { %s171_s23 = sshll.u32 %s150_s22, 4  ;;  %s169_s27 = scalar_lea.hbm %s597_s1, %s271_s24  ;;  %153 = vst [vmem:[%s150_s22] sm:$0xff] %v152_v0  ;;  %s551_s23 = int_to_ptr.vmem [resolvable:$true] %s171_s23 }
  0x2c   : > { %s155_s28 = scalar_lea.sflag [#allocation4], %s542_s13  ;;  %s362_s18 = scalar_lea.vmem %s551_s23, 128 }
  0x2d   : > { %p363_p8 = scmp.ne.s32.totalorder %s551_s23, %s362_s18  ;;  %s445_s29 = smov [#allocation5]  }
  0x2e   : > { %s366_s30 = sshll.u32 %s445_s29, 4  ;;  %s367_s30 = int_to_ptr.vmem [resolvable:$false] %s366_s30 }
  0x2f   : > { %p364_p11 = pnand %p363_p8, %p507_p9  ;;  %s368_s9 = scalar_lea.vmem %s367_s30, 256 }
  0x30   : > { %p369_p0 = scmp.lt.s32.totalorder %s551_s23, %s367_s30  ;;  %p370_p1 = scmp.lt.s32.totalorder %s368_s9, %s362_s18 }
  0x31   : > { %p365_p12 = pneg %p364_p11 }
  0x32   : > { %p371_p2 = por %p370_p1, %p369_p0 }
  0x34   : > { %p372_p3 = pnand %p371_p2, %p365_p12 }
  0x36   : > { %375 = shalt.err (!%p372_p3)
}
  0x37   : > { %s376_s2 = scalar_lea.hbm %s169_s27, 128  ;;  %s380_s5 = scalar_lea.hbm %s597_s1, 256 }
  0x38   : > { %p377_p5 = scmp.ne.s32.totalorder %s169_s27, %s376_s2  ;;  %p381_p10 = scmp.lt.s32.totalorder %s169_s27, %s597_s1 }
  0x39   : > { %p382_p4 = scmp.lt.s32.totalorder %s380_s5, %s376_s2 }
  0x3a   : > { %p378_p6 = pnand %p377_p5, %p507_p9 }
  0x3b   : > { %p383_p13 = por %p382_p4, %p381_p10 }
  0x3c   : > { %p379_p7 = pneg %p378_p6 }
  0x3e   : > { %p384_p8 = pnand %p383_p13, %p379_p7 }
  0x40   : > { %387 = shalt.err (!%p384_p8)
}
  0x41   : > { %274 = dma.vmem_to_hbm [thread:$0]  (%p507_p9), %s551_s23, 128, %s169_s27, %s155_s28  }
  0x42 PF: > { %s183_s15 = sand.u32 1, %s422_s6   ;;  %p603_p11 = scmp.ne.s32.totalorder %s601_s21, 0 }
  0x43   : > { %p604_p12 = scmp.ge.s32.totalorder %s442_s11, 2  ;;  %s184_s16 = scalar_lea.sflag [#allocation4], %s183_s15 }
  0x45   : > { %p281_p0 = pnand %p604_p12, %p603_p11 }
  0x47   : > { %p282_p1 = pneg %p281_p0 }
  0x49   : > { %417 = dma.done.wait (%p282_p1), %s184_s16, 128  }
  0x4a   : > { %419 = vsyncadd (%p282_p1), %s184_s16, 4294967168  ;;  %s17_s11 = sadd.s32 1, %s442_s11   ;;  %s605_s6 = smov %s426_s7 }
  0x4b   : > { %p14_p2 = scmp.ge.s32.totalorder %s17_s11, 4   ;;  %s606_s7 = smov %s430_s8 }
  0x4c   : > { %s607_s8 = smov %s512_s20  ;;  %s608_s9 = smov %s438_s10 }
  0x4d   : > { %s609_s10 = smov %s611_s14  ;;  %16 = sbr.rel (!%p14_p2) target bundleno = 6 (0x6), region = 69 }
  0x52   :  { %189 = vsyncpa [#allocation3], 1 }
  0x53   :  { %191 = vsyncpa [#allocation3 + $0x1], 1 }
  0x54   :  { %192 = vsyncpa [#allocation4], 1 }
  0x55   :  { %194 = vsyncpa [#allocation4 + $0x1], 1 }

</bundles_post_ra>
